<compile_context>
chip_gen: v7x
topology: tpu7x:2x2x1
jax: 0.10.0
libtpu: 0.0.40
codegen_flags: <defaults>
</compile_context>

<pallas_src>
import jax
import jax.numpy as jnp
from jax.experimental import pallas as pl
from jax.experimental.pallas import tpu as pltpu


def _round_up(x: int, m: int) -> int:
    return ((x + m - 1) // m) * m


def highway_kernel(x_ref, w_ref, b_ref, o_ref):
    E = o_ref.shape[-1]            # true embed size
    half = w_ref.shape[-1] // 2    # padded half width (multiple of 128, or == E)

    x_in = x_ref[...]
    # MXU operands in the weight dtype (bf16 weights => fast bf16 MXU path), f32 accumulate.
    x_mm = x_in if x_in.dtype == w_ref.dtype else x_in.astype(w_ref.dtype)
    y = jnp.dot(x_mm, w_ref[...], preferred_element_type=jnp.float32)
    y = y + b_ref[...].astype(jnp.float32)

    # Both slices start on a 128-lane boundary -> no cross-lane rotate at the split.
    x_proj = jnp.maximum(y[:, :E], 0.0)              # relu    (VPU)
    x_gate = jax.nn.sigmoid(y[:, half:half + E])     # sigmoid (EUP)

    xf = x_in.astype(jnp.float32)
    out = xf + x_gate * (x_proj - xf)                # 3-op highway combine
    o_ref[...] = out.astype(o_ref.dtype)


def make_highway_params(w_proj, b_proj, w_gate, b_gate, *, dtype=None):
    """Fuse the two Linear layers once, at model-init time (hoisted out of the hot path).

    w_*: [E, E] in PyTorch (out, in) layout; b_*: [E].
    Returns (w_fused [E, 2*Eh], b_fused [1, 2*Eh]) with Eh = round_up(E, 128) so the
    proj/gate split lands on a vreg lane boundary; padded columns are zero.
    Pass dtype=jnp.bfloat16 to run the GEMM on the fast bf16 MXU path (f32 accumulate).
    """
    w_proj = jnp.asarray(w_proj)
    w_gate = jnp.asarray(w_gate)
    b_proj = jnp.asarray(b_proj)
    b_gate = jnp.asarray(b_gate)
    E = w_proj.shape[0]
    Eh = _round_up(E, 128)
    if dtype is None:
        dtype = w_proj.dtype

    def prep_w(w):
        wt = w.T.astype(dtype)                         # (in, out)
        if Eh != E:
            wt = jnp.pad(wt, ((0, 0), (0, Eh - E)))
        return wt

    def prep_b(b):
        bf = b.astype(jnp.float32)
        if Eh != E:
            bf = jnp.pad(bf, (0, Eh - E))
        return bf

    w_fused = jnp.concatenate([prep_w(w_proj), prep_w(w_gate)], axis=1)       # [E, 2*Eh]
    b_fused = jnp.concatenate([prep_b(b_proj), prep_b(b_gate)]).reshape(1, 2 * Eh)
    return w_fused, b_fused


def _choose_block_rows(n_rows: int, block_rows: int) -> int:
    """Row tile: <= ~block_rows, multiple of 8, biased toward an even number of
    near-equal grid steps so the 'parallel' row axis balances across 2 TCs (v7x)."""
    if n_rows <= block_rows:
        return n_rows
    steps = -(-n_rows // block_rows)
    if steps % 2:
        steps += 1
    tn = -(-n_rows // steps)
    return _round_up(tn, 8)


def highway_apply(x, w_fused, b_fused, *, block_rows=1024):
    """Hot path: x [N, E] with prefused params from make_highway_params()."""
    N, E = x.shape
    two_eh = w_fused.shape[1]

    tn = _choose_block_rows(N, block_rows)
    grid = (pl.cdiv(N, tn),)

    in_item = jnp.dtype(x.dtype).itemsize
    w_bytes = w_fused.size * jnp.dtype(w_fused.dtype).itemsize
    b_bytes = b_fused.size * jnp.dtype(b_fused.dtype).itemsize

    # VMEM budget: double-buffered x/out tiles + single-buffered weight/bias + f32 GEMM
    # intermediate, with headroom. Floor at 16 MiB (safe everywhere), cap at 64 MiB (v7x).
    vmem_bytes = int(1.4 * (2 * 2 * tn * E * in_item       # x + out tiles, 2 buffers each
                            + w_bytes + b_bytes
                            + tn * two_eh * 4)) + (2 << 20)
    vmem_bytes = min(max(vmem_bytes, 16 << 20), 64 << 20)

    cost = pl.CostEstimate(
        flops=2 * N * E * two_eh,
        transcendentals=2 * N * (two_eh // 2),     # sigmoid = exp + reciprocal on the EUP
        bytes_accessed=2 * N * E * in_item + w_bytes + b_bytes,
    )

    return pl.pallas_call(
        highway_kernel,
        out_shape=jax.ShapeDtypeStruct((N, E), x.dtype),
        grid=grid,
        in_specs=[
            # x: streamed row tiles (default double-buffering).
            pl.BlockSpec((tn, E), lambda i: (i, 0)),
            # fused weight / bias: constant index_map => VMEM-resident, DMA'd once;
            # single-buffered since the block never changes.
            pl.BlockSpec((E, two_eh), lambda i: (0, 0), pipeline_mode=pl.Buffered(1)),
            pl.BlockSpec((1, two_eh), lambda i: (0, 0), pipeline_mode=pl.Buffered(1)),
        ],
        out_specs=pl.BlockSpec((tn, E), lambda i: (i, 0)),
        compiler_params=pltpu.CompilerParams(
            dimension_semantics=("parallel",),
            vmem_limit_bytes=vmem_bytes,
        ),
        cost_estimate=cost,
    )(x, w_fused, b_fused)


def highway(x, w_proj, b_proj, w_gate, b_gate, *, block_rows=1024, param_dtype=None):
    """Convenience wrapper matching the PyTorch layer. For repeated forward calls, hoist
    make_highway_params() to init time and call highway_apply() directly."""
    w_fused, b_fused = make_highway_params(w_proj, b_proj, w_gate, b_gate, dtype=param_dtype)
    return highway_apply(x, w_fused, b_fused, block_rows=block_rows)


def highway_ref(x, w_proj, b_proj, w_gate, b_gate):
    """Pure-JAX reference matching the PyTorch forward."""
    x_proj = jax.nn.relu(x @ w_proj.T + b_proj)
    x_gate = jax.nn.sigmoid(x @ w_gate.T + b_gate)
    return x_gate * x_proj + (1.0 - x_gate) * x


if __name__ == "__main__":
    word_embed_size = 32
    batch = 8  # flattened (sentence_len * batch) positions

    key = jax.random.PRNGKey(0)
    kx, kwp, kbp, kwg, kbg, kx2, kx3 = jax.random.split(key, 7)

    bound = 1.0 / jnp.sqrt(word_embed_size)
    w_proj = jax.random.uniform(kwp, (word_embed_size, word_embed_size),
                                minval=-bound, maxval=bound, dtype=jnp.float32)
    b_proj = jax.random.uniform(kbp, (word_embed_size,),
                                minval=-bound, maxval=bound, dtype=jnp.float32)
    w_gate = jax.random.uniform(kwg, (word_embed_size, word_embed_size),
                                minval=-bound, maxval=bound, dtype=jnp.float32)
    b_gate = jax.random.uniform(kbg, (word_embed_size,),
                                minval=-bound, maxval=bound, dtype=jnp.float32)

    # Hoisted param fusion (done once, reused by every call below).
    w_fused, b_fused = make_highway_params(w_proj, b_proj, w_gate, b_gate)

    # 1) Small single-block case (block shape == full array).
    x = jax.random.normal(kx, (batch, word_embed_size), dtype=jnp.float32)
    out = jax.block_until_ready(highway_apply(x, w_fused, b_fused))
    ref = highway_ref(x, w_proj, b_proj, w_gate, b_gate)
    assert out.shape == (batch, word_embed_size)
    assert jnp.allclose(out, ref, atol=1e-5, rtol=1e-5), "mismatch vs reference (small)"

    # 2) Multi-block case: balanced row grid (4 tiles of 264 rows) + padded last tile.
    x2 = jax.random.normal(kx2, (1040, word_embed_size), dtype=jnp.float32)
    out2 = jax.block_until_ready(highway_apply(x2, w_fused, b_fused, block_rows=512))
    ref2 = highway_ref(x2, w_proj, b_proj, w_gate, b_gate)
    assert jnp.allclose(out2, ref2, atol=1e-5, rtol=1e-5), "mismatch vs reference (tiled)"

    # 3) bf16-weight MXU path (f32 accumulate, caller-dtype store); looser tol by design.
    w_bf16, b_bf16 = make_highway_params(w_proj, b_proj, w_gate, b_gate, dtype=jnp.bfloat16)
    x3 = jax.random.normal(kx3, (64, word_embed_size), dtype=jnp.float32)
    out3 = jax.block_until_ready(highway_apply(x3, w_bf16, b_bf16))
    ref3 = highway_ref(x3, w_proj, b_proj, w_gate, b_gate)
    assert jnp.allclose(out3, ref3, atol=5e-2, rtol=5e-2), "mismatch vs reference (bf16)"

    print("KERNEL_OK")
</pallas_src>

<mosaic_0001>
module attributes {stable_mosaic.version = 11 : i64} {
  func.func @highway_kernel(%arg0: i32, %arg1: memref<8x32xf32, #tpu.memory_space<vmem>>, %arg2: memref<32x256xf32, #tpu.memory_space<vmem>>, %arg3: memref<1x256xf32, #tpu.memory_space<vmem>>, %arg4: memref<8x32xf32, #tpu.memory_space<vmem>>) attributes {dimension_semantics = [#tpu.dimension_semantics<parallel>], iteration_bounds = array<i64: 1>, scalar_prefetch = 0 : i64, scratch_operands = 0 : i64, tpu.core_type = #tpu.core_type<tc>, window_params = [{transform_indices = @transform_0, window_bounds = array<i64: 8, 32>}, {pipeline_mode = #tpu.pipeline_mode<synchronous>, transform_indices = @transform_1, window_bounds = array<i64: 32, 256>}, {pipeline_mode = #tpu.pipeline_mode<synchronous>, transform_indices = @transform_2, window_bounds = array<i64: 1, 256>}, {transform_indices = @transform_3, window_bounds = array<i64: 8, 32>}]} {
    %c0 = arith.constant 0 : index
    %c0_0 = arith.constant 0 : index
    %0 = vector.load %arg1[%c0, %c0_0] : memref<8x32xf32, #tpu.memory_space<vmem>>, vector<8x32xf32>
    %c0_1 = arith.constant 0 : index
    %c0_2 = arith.constant 0 : index
    %1 = vector.load %arg2[%c0_1, %c0_2] : memref<32x256xf32, #tpu.memory_space<vmem>>, vector<32x256xf32>
    %cst = arith.constant dense<0.000000e+00> : vector<8x256xf32>
    %2 = tpu.matmul %0, %1, %cst {dimension_numbers = #tpu.dot_dimension_numbers<[1], [0], [0], [1], [0, 0, 1, 1], [], []>} : vector<8x32xf32>, vector<32x256xf32>, vector<8x256xf32> -> vector<8x256xf32>
    %c0_3 = arith.constant 0 : index
    %c0_4 = arith.constant 0 : index
    %3 = vector.load %arg3[%c0_3, %c0_4] : memref<1x256xf32, #tpu.memory_space<vmem>>, vector<1x256xf32>
    %4 = vector.broadcast %3 : vector<1x256xf32> to vector<8x256xf32>
    %5 = arith.addf %2, %4 : vector<8x256xf32>
    %6 = vector.extract_strided_slice %5 {offsets = [0, 0], sizes = [8, 32], strides = [1, 1]} : vector<8x256xf32> to vector<8x32xf32>
    %cst_5 = arith.constant 0.000000e+00 : f32
    %7 = vector.broadcast %cst_5 : f32 to vector<8x32xf32>
    %8 = arith.maximumf %6, %7 : vector<8x32xf32>
    %9 = vector.extract_strided_slice %5 {offsets = [0, 128], sizes = [8, 32], strides = [1, 1]} : vector<8x256xf32> to vector<8x32xf32>
    %10 = arith.negf %9 : vector<8x32xf32>
    %11 = math.exp %10 : vector<8x32xf32>
    %cst_6 = arith.constant 1.000000e+00 : f32
    %12 = vector.broadcast %cst_6 : f32 to vector<8x32xf32>
    %13 = arith.addf %12, %11 : vector<8x32xf32>
    %14 = arith.divf %12, %13 : vector<8x32xf32>
    %15 = arith.subf %8, %0 : vector<8x32xf32>
    %16 = arith.mulf %14, %15 : vector<8x32xf32>
    %17 = arith.addf %0, %16 : vector<8x32xf32>
    %c0_7 = arith.constant 0 : index
    %c0_8 = arith.constant 0 : index
    %18 = vector.load %arg4[%c0_7, %c0_8] : memref<8x32xf32, #tpu.memory_space<vmem>>, vector<8x32xf32>
    tpu.vector_store %arg4[%c0_7, %c0_8], %17 {strides = array<i32>} : memref<8x32xf32, #tpu.memory_space<vmem>>, vector<8x32xf32>,
    return
  }
  func.func @transform_0(%arg0: i32) -> (i32, i32) {
    %c0_i32 = arith.constant 0 : i32
    %c0_i32_0 = arith.constant 0 : i32
    return %arg0, %c0_i32 : i32, i32
  }
  func.func @transform_1(%arg0: i32) -> (i32, i32) {
    %c0_i32 = arith.constant 0 : i32
    %c0_i32_0 = arith.constant 0 : i32
    %c0_i32_1 = arith.constant 0 : i32
    return %c0_i32, %c0_i32_0 : i32, i32
  }
  func.func @transform_2(%arg0: i32) -> (i32, i32) {
    %c0_i32 = arith.constant 0 : i32
    %c0_i32_0 = arith.constant 0 : i32
    %c0_i32_1 = arith.constant 0 : i32
    return %c0_i32, %c0_i32_0 : i32, i32
  }
  func.func @transform_3(%arg0: i32) -> (i32, i32) {
    %c0_i32 = arith.constant 0 : i32
    %c0_i32_0 = arith.constant 0 : i32
    return %arg0, %c0_i32 : i32, i32
  }
}

</mosaic_0001>

<bundles_post_ra>
// kernel: tpu_custom_call.1
= control target key start
LH: loop header
LB: loop body
LE: loop exit
PB: predicated region body
PF: predicated region fallthrough
CT: control target
= control target key end

     0   :  { %8 = vsyncpa [#allocation3], 0  ;;  %s330_s0 = inlined_call_operand.hbm [shape: f32[8,32], index: 0, kind: input, shape index: {}]   ;;  %s331_s1 = inlined_call_operand.hbm [shape: f32[32,256], index: 1, kind: input, shape index: {}]   ;;  %s332_s2 = inlined_call_operand.vmem [shape: f32[1,256], index: 2, kind: input, shape index: {}]   ;;  %s333_s3 = inlined_call_operand.hbm [shape: f32[8,32], index: 3, kind: output, shape index: {}]  }
   0x1   :  { %9 = vsyncpa [#allocation6], 0 }
   0x2   :  { %10 = vsyncpa [#allocation4], 0  ;;  %s256_s12 = smov [#allocation2]   ;;  %s257_s14 = smov [#allocation5]  }
   0x3   :  { %s17_s13 = sshll.u32 %s256_s12, 4  ;;  %s26_s15 = sshll.u32 %s257_s14, 4  ;;  %s18_s13 = int_to_ptr.vmem [resolvable:$true] %s17_s13  ;;  %s282_s15 = int_to_ptr.vmem [resolvable:$true] %s26_s15 }
   0x4   :  { %s184_s18 = scalar_lea.hbm %s330_s0, 128 }
   0x5   :  { %p185_p0 = scmp.ne.s32.totalorder %s330_s0, %s184_s18  ;;  %p188_p1 = scmp.lt.u32.totalorder %s184_s18, %s330_s0 }
   0x7   :  { %p190_p2 = pnand %p188_p1, %p185_p0 }
   0x9   :  { %193 = shalt.err (!%p190_p2)
}
   0xa   :  { %s194_s23 = scalar_lea.vmem %s18_s13, 128  ;;  %p199_p4 = scmp.lt.s32.totalorder %s18_s13, %s18_s13 }
   0xb   :  { %p195_p3 = scmp.ne.s32.totalorder %s18_s13, %s194_s23  ;;  %p200_p5 = scmp.lt.s32.totalorder %s194_s23, %s194_s23 }
   0xd   :  { %p201_p6 = por %p200_p5, %p199_p4 }
   0xf   :  { %p202_p7 = pnand %p201_p6, %p195_p3 }
  0x11   :  { %205 = shalt.err (!%p202_p7)
}
  0x12   :  { %20 = dma.hbm_to_vmem [thread:$0]  %s330_s0, 128, %s18_s13, [#allocation3]  }
  0x13   :  { %s206_s28 = scalar_lea.hbm %s331_s1, 1024 }
  0x14   :  { %p207_p8 = scmp.ne.s32.totalorder %s331_s1, %s206_s28  ;;  %p210_p9 = scmp.lt.u32.totalorder %s206_s28, %s331_s1 }
  0x16   :  { %p212_p10 = pnand %p210_p9, %p207_p8 }
  0x18   :  { %215 = shalt.err (!%p212_p10)
}
  0x19   :  { %s216_s6 = scalar_lea.vmem %s282_s15, 1024  ;;  %p221_p12 = scmp.lt.s32.totalorder %s282_s15, %s282_s15 }
  0x1a   :  { %p217_p11 = scmp.ne.s32.totalorder %s282_s15, %s216_s6  ;;  %p222_p13 = scmp.lt.s32.totalorder %s216_s6, %s216_s6 }
  0x1c   :  { %p223_p0 = por %p222_p13, %p221_p12 }
  0x1e   :  { %p224_p1 = pnand %p223_p0, %p217_p11 }
  0x20   :  { %227 = shalt.err (!%p224_p1)
}
  0x21   :  { %s258_s0 = smov 256   ;;  %s259_s7 = smov 16  }
  0x22   :  { %32 = dma.hbm_to_vmem [thread:$0]  %s331_s1, 1024, %s282_s15, [#allocation6], %s258_s0, %s258_s0, %s259_s7  }
  0x23   :  { %250 = dma.done.wait [#allocation3], 128  }
  0x24   :  { %251 = vsyncadd [#allocation3], 4294967168 }
  0x25   :  { %252 = dma.done.wait [#allocation6], 1024  }
  0x26   :  { %253 = vsyncadd [#allocation6], 4294966272  ;;  %v260_v0 = vmov 0.0   ;;  %v43_v1 = vld [vmem:[#allocation5 + $0x8] sm:$0xff]  ;;  %v45_v2 = vld [vmem:[#allocation5 + $0x18] sm:$0xff]  ;;  %vm62_vm0 = vcmask 261120   ;;  %v52_v14 = vlaneseq }
  0x27   :  { %130 = vmatprep.mubr.f32.mxu0 %v260_v0  ;;  %v42_v3 = vld [vmem:[#allocation5] sm:$0xff]  ;;  %v166_v4 = vpack.c.bf16 %v45_v2, %v43_v1  ;;  %v44_v5 = vld [vmem:[#allocation5 + $0x10] sm:$0xff]  ;;  %v47_v6 = vld [vmem:[#allocation5 + $0x28] sm:$0xff]  ;;  %s261_s11 = smov [#allocation7]  }
  0x28   :  { %v49_v7 = vld [vmem:[#allocation5 + $0x38] sm:$0xff]  ;;  %v168_v8 = vpack.c.bf16 %v44_v5, %v42_v3  ;;  %v46_v10 = vld [vmem:[#allocation5 + $0x20] sm:$0xff]  ;;  %v48_v11 = vld [vmem:[#allocation5 + $0x30] sm:$0xff]  ;;  %v53_v15 = vshrl.u32 %v52_v14, 7  ;;  %s154_s12 = sshll.u32 %s261_s11, 4  ;;  %s155_s12 = int_to_ptr.vmem [resolvable:$true] %s154_s12 }
  0x29   :  { %v170_v9 = vpack.c.bf16 %v49_v7, %v47_v6  ;;  %167 = vmatprep.subr.bf16.mxu0 %v166_v4  ;;  %v172_v12 = vpack.c.bf16 %v48_v11, %v46_v10  ;;  %v41_v13 = vld [vmem:[#allocation2] sm:$0xff]  ;;  %p233_p3 = scmp.lt.s32.totalorder %s155_s12, %s155_s12 }
  0x2a   :  { %169 = vmatpush1.bf16.msra.mxu0 %v168_v8  ;;  %v58_v16 = vsub.s32 1, %v53_v15  ;;  %v50_v17 = vld [vmem:[%s332_s2] sm:$0x3]  ;;  %v54_v23 = vsub.s32 0, %v53_v15  ;;  %s228_s2 = scalar_lea.vmem %s155_s12, 128 }
  0x2b   :  { %171 = vmatprep.subr.bf16.mxu0 %v170_v9  ;;  %p229_p2 = scmp.ne.s32.totalorder %s155_s12, %s228_s2  ;;  %p234_p4 = scmp.lt.s32.totalorder %s228_s2, %s228_s2 }
  0x2c   :  { %v59_v18 = vrot.slane %v50_v17, %v58_v16  ;;  %v55_v25 = vrot.slane %v50_v17, %v54_v23 }
  0x2d   :  { %p235_p5 = por %p234_p4, %p233_p3 }
  0x2e   :  { %173 = vmatpush1.bf16.msra.mxu0 %v172_v12 }
  0x2f   :  { %p236_p6 = pnand %p235_p5, %p229_p2 }
  0x31   :  { %164 = vmatmul.mubr.msk.f32.vlgmr.msra.gmra.mrb[0].mxu0 %vm62_vm0, %v41_v13 }
 0x104   :  { %v132_v19 = vpop.f32.mrb[0].mxu0 }
 0x105   :  { %v134_v20 = vpop.f32.mrb[1].mxu0  ;;  %v133_v27 = vadd.f32 %v132_v19, %v55_v25 }
 0x106   :  { %v135_v21 = vadd.f32 %v134_v20, %v59_v18 }
 0x107   :  { %v137_v28 = vmax.f32 %v133_v27, 0.0 }
 0x108   :  { %v165_v22 = vmul.f32 -1.442695, %v135_v21 }
 0x109   :  { %v144_v29 = vsub.f32 %v137_v28, %v41_v13 }
 0x10a   :  { %180 = vpow2.f32 %v165_v22 }
 0x114   :  { %v181_v24 = vpop.eup %180 }
 0x115   :  { %v141_v26 = vadd.f32 1.0, %v181_v24 }
 0x117   :  { %182 = vrcp.f32 %v141_v26 }
 0x121   :  { %v183_v30 = vpop.eup %182 }
 0x122   :  { %v145_v31 = vmul.f32 %v183_v30, %v144_v29 }
 0x124   :  { %v146_v32 = vadd.f32 %v145_v31, %v41_v13 }
 0x126   :  { %147 = vst.msk [vmem:[#allocation7] sm:$0xff] %vm62_vm0, %v146_v32 }
 0x127   :  { %239 = shalt.err (!%p236_p6)
}
 0x128   :  { %s240_s15 = scalar_lea.hbm %s333_s3, 128 }
 0x129   :  { %p241_p7 = scmp.ne.s32.totalorder %s333_s3, %s240_s15  ;;  %p244_p8 = scmp.lt.u32.totalorder %s240_s15, %s333_s3 }
 0x12b   :  { %p246_p9 = pnand %p244_p8, %p241_p7 }
 0x12d   :  { %249 = shalt.err (!%p246_p9)
}
 0x12e   :  { %157 = dma.vmem_to_hbm [thread:$0]  %s155_s12, 128, %s333_s3, [#allocation4]  }
 0x12f   :  { %254 = dma.done.wait [#allocation4], 128  }
 0x130   :  { %255 = vsyncadd [#allocation4], 4294967168 }
 0x131   :  { %161 = vsyncpa [#allocation3], 1 }
 0x132   :  { %162 = vsyncpa [#allocation6], 1 }
 0x133   :  { %163 = vsyncpa [#allocation4], 1 }

</bundles_post_ra>
